<compile_context>
chip_gen: v6e
topology: v6e:2x2x1
jax: 0.10.0
libtpu: 0.0.40
codegen_flags: <defaults>
</compile_context>

<pallas_src>
import functools

import jax
import jax.numpy as jnp
from jax.experimental import pallas as pl
from jax.experimental.pallas import tpu as pltpu


def _round_up(x, m):
    return (x + m - 1) // m * m


def _ffn_ln_kernel(x_ref, w1_ref, b1_ref, w2_ref, params_ref, o_ref, acc_ref):
    """One (row-tile, d_hid-tile) grid step.

    x_ref:      (tm, d_in)   f32 activations (residual source, kept f32)
    w1_ref:     (d_in, tk)   bf16 (or f32) W1 column tile
    b1_ref:     (1, tk)      f32 bias tile for W1
    w2_ref:     (tk, d_in)   bf16 (or f32) W2 row tile
    params_ref: (3, d_in)    f32 packed [b2; gamma; beta]
    o_ref:      (tm, d_in)   output tile (written on last k step)
    acc_ref:    (tm, d_in)   f32 VMEM accumulator for the second matmul
    """
    k = pl.program_id(1)

    @pl.when(k == 0)
    def _init():
        acc_ref[...] = jnp.zeros_like(acc_ref)

    compute_dtype = w1_ref.dtype                      # bf16 (or f32 fallback)
    x_f32 = x_ref[...].astype(jnp.float32)            # residual stays f32

    # w_1 slice + ReLU  (MXU matmul, bf16 in, f32 accumulate)
    h = jnp.dot(x_f32.astype(compute_dtype), w1_ref[...],
                preferred_element_type=jnp.float32)
    h = h + b1_ref[...].astype(jnp.float32)
    h = jnp.maximum(h, 0.0)                           # (tm, tk)

    # partial w_2 contribution of this d_hid tile, accumulated in f32
    acc_ref[...] += jnp.dot(h.astype(compute_dtype), w2_ref[...],
                            preferred_element_type=jnp.float32)

    @pl.when(k == pl.num_programs(1) - 1)
    def _epilogue():
        p = params_ref[...].astype(jnp.float32)       # (3, d_in)
        b2 = p[0:1, :]
        gamma = p[1:2, :]
        beta = p[2:3, :]

        # TODO(synk): dropout is identity here (inference mode); training-mode
        # dropout would use pltpu.prng_random_bits + mask before the residual.
        y = acc_ref[...] + b2 + x_f32                 # bias + residual (f32)

        # LayerNorm over last dim (biased variance, eps=1e-6), like nn.LayerNorm
        mean = jnp.mean(y, axis=-1, keepdims=True)
        cent = y - mean
        var = jnp.mean(cent * cent, axis=-1, keepdims=True)
        normed = cent * jax.lax.rsqrt(var + 1e-6)
        o_ref[...] = (normed * gamma + beta).astype(o_ref.dtype)


def positionwise_feed_forward(x, w1, b1, w2, b2, gamma, beta, *,
                              tm=256, tk=512, use_bf16_matmul=True):
    """x: (B, S, d_in) float32. Returns same shape/dtype."""
    B, S, d_in = x.shape
    d_hid = w1.shape[1]
    M = B * S

    # --- tile sizing (shrink gracefully for tiny demo shapes) ---------------
    tm = min(tm, _round_up(M, 8))          # rows per block (multiple of 8)
    M_pad = _round_up(M, tm)
    tk = min(tk, d_hid)                    # d_hid reduction tile
    d_hid_pad = _round_up(d_hid, tk)

    # --- wrapper-side layout / padding / dtype prep -------------------------
    x2 = x.reshape(M, d_in)
    if M_pad != M:
        x2 = jnp.pad(x2, ((0, M_pad - M), (0, 0)))

    w1p, b1p, w2p = w1, b1, w2
    if d_hid_pad != d_hid:
        # zero-padded hidden units contribute relu(0 + 0) @ 0 = 0 -> exact.
        w1p = jnp.pad(w1, ((0, 0), (0, d_hid_pad - d_hid)))
        b1p = jnp.pad(b1, (0, d_hid_pad - d_hid))
        w2p = jnp.pad(w2, ((0, d_hid_pad - d_hid), (0, 0)))

    compute_dtype = jnp.bfloat16 if use_bf16_matmul else x.dtype
    w1p = w1p.astype(compute_dtype)        # halves weight DMA/VMEM when bf16
    w2p = w2p.astype(compute_dtype)
    b1_2 = b1p.reshape(1, d_hid_pad).astype(jnp.float32)
    params = jnp.stack([b2, gamma, beta], axis=0).astype(jnp.float32)  # (3, d_in)

    # --- VMEM budget (double-buffered blocks + accumulator) -----------------
    wbytes = 2 if use_bf16_matmul else 4
    vmem_est = (2 * tm * d_in * 4            # x blocks
                + 2 * d_in * tk * wbytes     # W1 blocks
                + 2 * tk * d_in * wbytes     # W2 blocks
                + 2 * 8 * tk * 4             # b1 (sublane-padded)
                + 2 * 8 * d_in * 4           # packed params
                + 2 * tm * d_in * 4          # out blocks
                + tm * d_in * 4)             # f32 accumulator scratch
    vmem_limit = min(max(2 * vmem_est + (4 << 20), 32 << 20), 64 << 20)

    grid = (M_pad // tm, d_hid_pad // tk)

    out = pl.pallas_call(
        _ffn_ln_kernel,
        out_shape=jax.ShapeDtypeStruct((M_pad, d_in), x.dtype),
        grid_spec=pltpu.PrefetchScalarGridSpec(
            num_scalar_prefetch=0,
            grid=grid,
            in_specs=[
                pl.BlockSpec((tm, d_in), lambda i, k: (i, 0)),    # x rows
                pl.BlockSpec((d_in, tk), lambda i, k: (0, k)),    # W1[:, k]
                pl.BlockSpec((1, tk), lambda i, k: (0, k)),       # b1[k]
                pl.BlockSpec((tk, d_in), lambda i, k: (k, 0)),    # W2[k, :]
                pl.BlockSpec((3, d_in), lambda i, k: (0, 0)),     # [b2;gamma;beta]
            ],
            out_specs=pl.BlockSpec((tm, d_in), lambda i, k: (i, 0)),
            scratch_shapes=[pltpu.VMEM((tm, d_in), jnp.float32)],
        ),
        compiler_params=pltpu.CompilerParams(
            dimension_semantics=("parallel", "arbitrary"),
            vmem_limit_bytes=vmem_limit,
        ),
    )(x2, w1p, b1_2, w2p, params)

    return out[:M].reshape(B, S, d_in)


def _reference(x, w1, b1, w2, b2, gamma, beta, compute_dtype=jnp.float32):
    """Pure-JAX reference; compute_dtype mirrors the kernel's matmul precision."""
    xc = x.astype(compute_dtype)
    h = jnp.dot(xc, w1.astype(compute_dtype),
                preferred_element_type=jnp.float32) + b1
    h = jnp.maximum(h, 0.0)
    y = jnp.dot(h.astype(compute_dtype), w2.astype(compute_dtype),
                preferred_element_type=jnp.float32) + b2 + x
    mean = jnp.mean(y, axis=-1, keepdims=True)
    var = jnp.mean((y - mean) ** 2, axis=-1, keepdims=True)
    return (y - mean) * jax.lax.rsqrt(var + 1e-6) * gamma + beta


if __name__ == "__main__":
    B, S, d_in, d_hid = 2, 8, 32, 64

    key = jax.random.PRNGKey(0)
    kx, k1, k2, k3, k4 = jax.random.split(key, 5)

    x = jax.random.normal(kx, (B, S, d_in), dtype=jnp.float32)

    # deterministic parameter init (Linear-like scales); LayerNorm gamma=1, beta=0
    w1 = jax.random.normal(k1, (d_in, d_hid), dtype=jnp.float32) * (1.0 / jnp.sqrt(d_in))
    b1 = jax.random.normal(k2, (d_hid,), dtype=jnp.float32) * 0.01
    w2 = jax.random.normal(k3, (d_hid, d_in), dtype=jnp.float32) * (1.0 / jnp.sqrt(d_hid))
    b2 = jax.random.normal(k4, (d_in,), dtype=jnp.float32) * 0.01
    gamma = jnp.ones((d_in,), dtype=jnp.float32)
    beta = jnp.zeros((d_in,), dtype=jnp.float32)

    out = positionwise_feed_forward(x, w1, b1, w2, b2, gamma, beta)
    out = jax.block_until_ready(out)

    assert out.shape == x.shape and out.dtype == x.dtype

    # Tight check against a reference that mirrors the bf16-matmul / f32-accum path.
    ref_bf16 = _reference(x, w1, b1, w2, b2, gamma, beta, compute_dtype=jnp.bfloat16)
    assert jnp.allclose(out, ref_bf16, atol=2e-3, rtol=2e-3), "mismatch vs bf16-matched reference"

    # Loose check against the exact f32 module semantics (bf16 MXU rounding only).
    ref_f32 = _reference(x, w1, b1, w2, b2, gamma, beta, compute_dtype=jnp.float32)
    assert jnp.allclose(out, ref_f32, atol=5e-2, rtol=5e-2), "mismatch vs f32 reference"

    print("KERNEL_OK")
</pallas_src>

<mosaic_0001>
module attributes {stable_mosaic.version = 11 : i64} {
  func.func @_ffn_ln_kernel(%arg0: i32, %arg1: i32, %arg2: memref<16x32xf32, #tpu.memory_space<vmem>>, %arg3: memref<32x64xbf16, #tpu.memory_space<vmem>>, %arg4: memref<1x64xf32, #tpu.memory_space<vmem>>, %arg5: memref<64x32xbf16, #tpu.memory_space<vmem>>, %arg6: memref<3x32xf32, #tpu.memory_space<vmem>>, %arg7: memref<16x32xf32, #tpu.memory_space<vmem>>, %arg8: memref<16x32xf32, #tpu.memory_space<vmem>>) attributes {dimension_semantics = [#tpu.dimension_semantics<parallel>, #tpu.dimension_semantics<arbitrary>], iteration_bounds = array<i64: 1, 1>, scalar_prefetch = 0 : i64, scratch_operands = 1 : i64, tpu.core_type = #tpu.core_type<tc>, window_params = [{transform_indices = @transform_0, window_bounds = array<i64: 16, 32>}, {transform_indices = @transform_1, window_bounds = array<i64: 32, 64>}, {transform_indices = @transform_2, window_bounds = array<i64: 1, 64>}, {transform_indices = @transform_3, window_bounds = array<i64: 64, 32>}, {pipeline_mode = #tpu.pipeline_mode<synchronous>, transform_indices = @transform_4, window_bounds = array<i64: 3, 32>}, {transform_indices = @transform_5, window_bounds = array<i64: 16, 32>}]} {
    %c0_i32 = arith.constant 0 : i32
    %0 = arith.cmpi eq, %arg1, %c0_i32 : i32
    %1 = arith.extui %0 : i1 to i32
    %c0_i32_0 = arith.constant 0 : i32
    %2 = arith.cmpi ne, %1, %c0_i32_0 : i32
    scf.if %2 {
      %cst_16 = arith.constant 0.000000e+00 : f32
      %21 = vector.broadcast %cst_16 : f32 to vector<16x32xf32>
      %c0_17 = arith.constant 0 : index
      %c0_18 = arith.constant 0 : index
      %22 = vector.load %arg8[%c0_17, %c0_18] : memref<16x32xf32, #tpu.memory_space<vmem>>, vector<16x32xf32>
      tpu.vector_store %arg8[%c0_17, %c0_18], %21 {strides = array<i32>} : memref<16x32xf32, #tpu.memory_space<vmem>>, vector<16x32xf32>,
    } else {
    }
    %c0 = arith.constant 0 : index
    %c0_1 = arith.constant 0 : index
    %3 = vector.load %arg2[%c0, %c0_1] : memref<16x32xf32, #tpu.memory_space<vmem>>, vector<16x32xf32>
    %4 = arith.truncf %3 : vector<16x32xf32> to vector<16x32xbf16>
    %c0_2 = arith.constant 0 : index
    %c0_3 = arith.constant 0 : index
    %5 = vector.load %arg3[%c0_2, %c0_3] : memref<32x64xbf16, #tpu.memory_space<vmem>>, vector<32x64xbf16>
    %cst = arith.constant dense<0.000000e+00> : vector<16x64xf32>
    %6 = tpu.matmul %4, %5, %cst {dimension_numbers = #tpu.dot_dimension_numbers<[1], [0], [0], [1], [0, 0, 1, 1], [], []>} : vector<16x32xbf16>, vector<32x64xbf16>, vector<16x64xf32> -> vector<16x64xf32>
    %c0_4 = arith.constant 0 : index
    %c0_5 = arith.constant 0 : index
    %7 = vector.load %arg4[%c0_4, %c0_5] : memref<1x64xf32, #tpu.memory_space<vmem>>, vector<1x64xf32>
    %8 = vector.broadcast %7 : vector<1x64xf32> to vector<16x64xf32>
    %9 = arith.addf %6, %8 : vector<16x64xf32>
    %cst_6 = arith.constant 0.000000e+00 : f32
    %10 = vector.broadcast %cst_6 : f32 to vector<16x64xf32>
    %11 = arith.maximumf %9, %10 : vector<16x64xf32>
    %c0_7 = arith.constant 0 : index
    %c0_8 = arith.constant 0 : index
    %12 = vector.load %arg8[%c0_7, %c0_8] : memref<16x32xf32, #tpu.memory_space<vmem>>, vector<16x32xf32>
    %13 = arith.truncf %11 : vector<16x64xf32> to vector<16x64xbf16>
    %c0_9 = arith.constant 0 : index
    %c0_10 = arith.constant 0 : index
    %14 = vector.load %arg5[%c0_9, %c0_10] : memref<64x32xbf16, #tpu.memory_space<vmem>>, vector<64x32xbf16>
    %cst_11 = arith.constant dense<0.000000e+00> : vector<16x32xf32>
    %15 = tpu.matmul %13, %14, %cst_11 {dimension_numbers = #tpu.dot_dimension_numbers<[1], [0], [0], [1], [0, 0, 1, 1], [], []>} : vector<16x64xbf16>, vector<64x32xbf16>, vector<16x32xf32> -> vector<16x32xf32>
    %16 = arith.addf %12, %15 : vector<16x32xf32>
    %c0_12 = arith.constant 0 : index
    %c0_13 = arith.constant 0 : index
    %17 = vector.load %arg8[%c0_12, %c0_13] : memref<16x32xf32, #tpu.memory_space<vmem>>, vector<16x32xf32>
    tpu.vector_store %arg8[%c0_12, %c0_13], %16 {strides = array<i32>} : memref<16x32xf32, #tpu.memory_space<vmem>>, vector<16x32xf32>,
    %c0_i32_14 = arith.constant 0 : i32
    %18 = arith.cmpi eq, %arg1, %c0_i32_14 : i32
    %19 = arith.extui %18 : i1 to i32
    %c0_i32_15 = arith.constant 0 : i32
    %20 = arith.cmpi ne, %19, %c0_i32_15 : i32
    scf.if %20 {
      %c0_16 = arith.constant 0 : index
      %c0_17 = arith.constant 0 : index
      %21 = vector.load %arg6[%c0_16, %c0_17] : memref<3x32xf32, #tpu.memory_space<vmem>>, vector<3x32xf32>
      %22 = vector.extract_strided_slice %21 {offsets = [0, 0], sizes = [1, 32], strides = [1, 1]} : vector<3x32xf32> to vector<1x32xf32>
      %23 = vector.extract_strided_slice %21 {offsets = [1, 0], sizes = [1, 32], strides = [1, 1]} : vector<3x32xf32> to vector<1x32xf32>
      %24 = vector.extract_strided_slice %21 {offsets = [2, 0], sizes = [1, 32], strides = [1, 1]} : vector<3x32xf32> to vector<1x32xf32>
      %c0_18 = arith.constant 0 : index
      %c0_19 = arith.constant 0 : index
      %25 = vector.load %arg8[%c0_18, %c0_19] : memref<16x32xf32, #tpu.memory_space<vmem>>, vector<16x32xf32>
      %26 = vector.broadcast %22 : vector<1x32xf32> to vector<16x32xf32>
      %27 = arith.addf %25, %26 : vector<16x32xf32>
      %28 = arith.addf %27, %3 : vector<16x32xf32>
      %cst_20 = arith.constant dense<0.000000e+00> : vector<16xf32>
      %29 = vector.multi_reduction <add>, %28, %cst_20 [1] : vector<16x32xf32> to vector<16xf32>
      %30 = vector.shape_cast %29 : vector<16xf32> to vector<16x1xf32>
      %cst_21 = arith.constant 3.200000e+01 : f32
      %31 = vector.broadcast %cst_21 : f32 to vector<16x1xf32>
      %32 = arith.divf %30, %31 : vector<16x1xf32>
      %33 = vector.broadcast %32 : vector<16x1xf32> to vector<16x32xf32>
      %34 = arith.subf %28, %33 : vector<16x32xf32>
      %35 = arith.mulf %34, %34 : vector<16x32xf32>
      %cst_22 = arith.constant dense<0.000000e+00> : vector<16xf32>
      %36 = vector.multi_reduction <add>, %35, %cst_22 [1] : vector<16x32xf32> to vector<16xf32>
      %37 = vector.shape_cast %36 : vector<16xf32> to vector<16x1xf32>
      %cst_23 = arith.constant 3.200000e+01 : f32
      %38 = vector.broadcast %cst_23 : f32 to vector<16x1xf32>
      %39 = arith.divf %37, %38 : vector<16x1xf32>
      %cst_24 = arith.constant 9.99999997E-7 : f32
      %40 = vector.broadcast %cst_24 : f32 to vector<16x1xf32>
      %41 = arith.addf %39, %40 : vector<16x1xf32>
      %42 = math.rsqrt %41 : vector<16x1xf32>
      %43 = vector.broadcast %42 : vector<16x1xf32> to vector<16x32xf32>
      %44 = arith.mulf %34, %43 : vector<16x32xf32>
      %45 = vector.broadcast %23 : vector<1x32xf32> to vector<16x32xf32>
      %46 = arith.mulf %44, %45 : vector<16x32xf32>
      %47 = vector.broadcast %24 : vector<1x32xf32> to vector<16x32xf32>
      %48 = arith.addf %46, %47 : vector<16x32xf32>
      %c0_25 = arith.constant 0 : index
      %c0_26 = arith.constant 0 : index
      %49 = vector.load %arg7[%c0_25, %c0_26] : memref<16x32xf32, #tpu.memory_space<vmem>>, vector<16x32xf32>
      tpu.vector_store %arg7[%c0_25, %c0_26], %48 {strides = array<i32>} : memref<16x32xf32, #tpu.memory_space<vmem>>, vector<16x32xf32>,
    } else {
    }
    return
  }
  func.func @transform_0(%arg0: i32, %arg1: i32) -> (i32, i32) {
    %c0_i32 = arith.constant 0 : i32
    %c0_i32_0 = arith.constant 0 : i32
    return %arg0, %c0_i32 : i32, i32
  }
  func.func @transform_1(%arg0: i32, %arg1: i32) -> (i32, i32) {
    %c0_i32 = arith.constant 0 : i32
    %c0_i32_0 = arith.constant 0 : i32
    return %c0_i32, %arg1 : i32, i32
  }
  func.func @transform_2(%arg0: i32, %arg1: i32) -> (i32, i32) {
    %c0_i32 = arith.constant 0 : i32
    %c0_i32_0 = arith.constant 0 : i32
    return %c0_i32, %arg1 : i32, i32
  }
  func.func @transform_3(%arg0: i32, %arg1: i32) -> (i32, i32) {
    %c0_i32 = arith.constant 0 : i32
    %c0_i32_0 = arith.constant 0 : i32
    return %arg1, %c0_i32 : i32, i32
  }
  func.func @transform_4(%arg0: i32, %arg1: i32) -> (i32, i32) {
    %c0_i32 = arith.constant 0 : i32
    %c0_i32_0 = arith.constant 0 : i32
    %c0_i32_1 = arith.constant 0 : i32
    return %c0_i32, %c0_i32_0 : i32, i32
  }
  func.func @transform_5(%arg0: i32, %arg1: i32) -> (i32, i32) {
    %c0_i32 = arith.constant 0 : i32
    %c0_i32_0 = arith.constant 0 : i32
    return %arg0, %c0_i32 : i32, i32
  }
}

</mosaic_0001>

<bundles_post_ra>
// kernel: tpu_custom_call.1
= control target key start
LH: loop header
LB: loop body
LE: loop exit
PB: predicated region body
PF: predicated region fallthrough
CT: control target
= control target key end

     0   :  { %v331_v1 = vmov 0.0   ;;  %vm332_vm0 = vmmov 0   ;;  %vm26_vm1 = vcmask 261120   ;;  %s410_s0 = inlined_call_operand.vmem [shape: f32[16,32], index: 0, kind: input, shape index: {}]   ;;  %s411_s1 = inlined_call_operand.vmem [shape: bf16[32,64], index: 1, kind: input, shape index: {}]   ;;  %s412_s2 = inlined_call_operand.vmem [shape: f32[1,64], index: 2, kind: input, shape index: {}]   ;;  %s413_s3 = inlined_call_operand.vmem [shape: bf16[64,32], index: 3, kind: input, shape index: {}]   ;;  %s414_s4 = inlined_call_operand.vmem [shape: f32[3,32], index: 4, kind: input, shape index: {}]   ;;  %s415_s5 = inlined_call_operand.hbm [shape: f32[16,32], index: 5, kind: output, shape index: {}]  }
   0x1   :  { %v299_v0 = vld [vmem:[%s411_s1 + $0x8] sm:$0xff]   ;;  %274 = vmatprep.subr.bf16.mxu0 %v331_v1  ;;  %v300_v2 = vld [vmem:[%s411_s1] sm:$0xff]   ;;  %282 = vmatprep.subr.bf16.mxu1 %v331_v1  ;;  %27 = vst.msk [vmem:[#allocation2] sm:$0xff] %vm26_vm1, %v331_v1  ;;  %28 = vst.msk [vmem:[#allocation2 + $0x8] sm:$0xff] %vm26_vm1, %v331_v1 }
   0x2   :  { %275 = vmatpush3.bf16.msra.mxu0 %v299_v0  ;;  %278 = vmatprep.mubr.msk.bf16.mxu0 %vm332_vm0, %v331_v1  ;;  %v29_v3 = vld [vmem:[%s410_s0] sm:$0xff]  ;;  %v30_v4 = vld [vmem:[%s410_s0 + $0x8] sm:$0xff]  ;;  %v301_v5 = vld [vmem:[%s413_s3 + $0x18] sm:$0xff]  }
   0x3   :  { %276 = vmatprep.subr.bf16.mxu0 %v331_v1  ;;  %290 = vmatprep.mubr.msk.bf16.mxu1 %vm332_vm0, %v331_v1  ;;  %v31_v6 = vpack.c.bf16 %v30_v4, %v29_v3 }
   0x4   :  { %283 = vmatpush3.bf16.msra.mxu1 %v301_v5 }
   0x5   :  { %284 = vmatprep.subr.bf16.mxu1 %v331_v1 }
   0x6   :  { %277 = vmatpush3.bf16.msra.mxu0 %v300_v2 }
   0x7   :  { %10 = vsyncpa [#allocation4], 0  ;;  %v302_v7 = vld [vmem:[%s413_s3 + $0x10] sm:$0xff]   ;;  %v303_v8 = vld [vmem:[%s413_s3 + $0x8] sm:$0xff]   ;;  %vm137_vm2 = vcmask 523264   ;;  %v192_v20 = vlaneseq }
   0x8   :  { %285 = vmatpush3.bf16.msra.mxu1 %v302_v7  ;;  %v304_v9 = vld [vmem:[%s413_s3] sm:$0xff]   ;;  %v103_v31 = vld [vmem:[#allocation2 + $0x8] sm:$0xff] }
   0x9   :  { %279 = vmatmul.mubr.msk.bf16.vlgmr.msra.gmra.mxu0 %vm26_vm1, %v31_v6  ;;  %286 = vmatprep.subr.bf16.mxu1 %v331_v1  ;;  %v257_v10 = vld [vmem:[%s412_s2] ss:$0 sm:$0xff]  ;;  %v193_v21 = vshrl.u32 %v192_v20, 7  ;;  %s333_s2 = smov [#allocation3]  }
   0xa   :  { %v189_v24 = vld [vmem:[%s414_s4] sm:$0x7]  ;;  %s246_s4 = sshll.u32 %s333_s2, 4  ;;  %s247_s4 = int_to_ptr.vmem [resolvable:$true] %s246_s4 }
   0xb   :  { %v229_v22 = vsub.s32 1, %v193_v21  ;;  %v235_v23 = vsub.s32 2, %v193_v21  ;;  %v102_v27 = vld [vmem:[#allocation2] sm:$0xff]  ;;  %v194_v32 = vsub.s32 0, %v193_v21  ;;  %s309_s10 = scalar_lea.vmem %s247_s4, 256  ;;  %p314_p1 = scmp.lt.s32.totalorder %s247_s4, %s247_s4 }
   0xc   :  { %287 = vmatpush3.bf16.msra.mxu1 %v303_v8  ;;  %p310_p0 = scmp.ne.s32.totalorder %s247_s4, %s309_s10  ;;  %p315_p2 = scmp.lt.s32.totalorder %s309_s10, %s309_s10 }
   0xd   :  { %288 = vmatprep.subr.bf16.mxu1 %v331_v1  ;;  %v230_v25 = vrot.slane %v189_v24, %v229_v22  ;;  %v236_v26 = vrot.slane %v189_v24, %v235_v23  ;;  %v195_v36 = vrot.slane %v189_v24, %v194_v32 }
   0xe   :  { %p316_p3 = por %p315_p2, %p314_p1 }
  0x10   :  { %289 = vmatpush3.bf16.msra.mxu1 %v304_v9  ;;  %p317_p4 = pnand %p316_p3, %p310_p0 }
  0xc9   :  { %v93_v11 = vpop.f32.mrf.mxu0 }
  0xca   :  { %v94_v13 = vadd.f32 %v257_v10, %v93_v11 }
  0xcb   :  { %v280_v12 = vpop.f32.mrf.mxu0 }
  0xcc   :  { %v100_v17 = vmax.f32 %v94_v13, 0.0 }
  0xcd   :  { %v96_v14 = vpop.f32.mrf.mxu0 }
  0xce   :  { %v97_v15 = vadd.f32 %v257_v10, %v96_v14 }
  0xcf   :  { %v281_v16 = vpop.f32.mrf.mxu0 }
  0xd0   :  { %v101_v18 = vmax.f32 %v97_v15, 0.0 }
  0xd2   :  { %v104_v19 = vpack.c.bf16 %v101_v18, %v100_v17 }
  0xd4   :  { %291 = vmatmul.mubr.msk.bf16.vlgmr.msra.gmra.mxu1 %vm137_vm2, %v104_v19 }
 0x194   :  { %v175_v28 = vpop.f32.mrf.mxu1 }
 0x195   :  { %v182_v29 = vadd.f32 %v175_v28, %v102_v27 }
 0x196   :  { %v292_v30 = vpop.f32.mrf.mxu1 }
 0x197   :  { %184 = vst.msk [vmem:[#allocation2] sm:$0xff] %vm26_vm1, %v182_v29 }
 0x198   :  { %v178_v33 = vpop.f32.mrf.mxu1 }
 0x199   :  { %v183_v34 = vadd.f32 %v178_v33, %v103_v31 }
 0x19a   :  { %v293_v35 = vpop.f32.mrf.mxu1 }
 0x19b   :  { %185 = vst.msk [vmem:[#allocation2 + $0x8] sm:$0xff] %vm26_vm1, %v183_v34 }
 0x19e   :  { %v190_v37 = vld [vmem:[#allocation2] sm:$0xff] }
 0x19f   :  { %v196_v38 = vadd.f32 %v195_v36, %v190_v37 }
 0x1a1   :  { %v198_v39 = vadd.f32 %v196_v38, %v29_v3 }
 0x1a2   :  { %v191_v40 = vld [vmem:[#allocation2 + $0x8] sm:$0xff] }
 0x1a3   :  { %v200_v41 = vsel %vm26_vm1, %v198_v39, 0.0  ;;  %v197_v42 = vadd.f32 %v195_v36, %v191_v40 }
 0x1a4   :  { %201 = vadd.xlane.f32.xlu0 %v200_v41 }
 0x1a5   :  { %v199_v43 = vadd.f32 %v197_v42, %v30_v4 }
 0x1a7   :  { %v203_v44 = vsel %vm26_vm1, %v199_v43, 0.0 }
 0x1a8   :  { %204 = vadd.xlane.f32.xlu0 %v203_v44 }
 0x22d   :  { %v202_v45 = vpop.xlane.xlu0 %201 }
 0x22e   :  { %v207_v46 = vmul.f32 0.03125, %v202_v45 }
 0x230   :  { %v209_v47 = vsub.f32 %v198_v39, %v207_v46 }
 0x231   :  { %v205_v48 = vpop.xlane.xlu0 %204 }
 0x232   :  { %v208_v49 = vmul.f32 0.03125, %v205_v48  ;;  %v211_v50 = vmul.f32 %v209_v47, %v209_v47 }
 0x234   :  { %v210_v51 = vsub.f32 %v199_v43, %v208_v49  ;;  %v213_v52 = vsel %vm26_vm1, %v211_v50, 0.0 }
 0x235   :  { %214 = vadd.xlane.f32.xlu1 %v213_v52 }
 0x236   :  { %v212_v53 = vmul.f32 %v210_v51, %v210_v51 }
 0x238   :  { %v216_v54 = vsel %vm26_vm1, %v212_v53, 0.0 }
 0x239   :  { %217 = vadd.xlane.f32.xlu1 %v216_v54 }
 0x2be   :  { %v215_v55 = vpop.xlane.xlu1 %214 }
 0x2bf   :  { %v219_v56 = vmul.f32 0.03125, %v215_v55 }
 0x2c1   :  { %v221_v57 = vadd.f32 1e-06, %v219_v56 }
 0x2c2   :  { %v218_v58 = vpop.xlane.xlu1 %217 }
 0x2c3   :  { %305 = vrsqrt.f32 %v221_v57  ;;  %v220_v59 = vmul.f32 0.03125, %v218_v58 }
 0x2c5   :  { %v222_v60 = vadd.f32 1e-06, %v220_v59 }
 0x2c7   :  { %307 = vrsqrt.f32 %v222_v60 }
 0x2d0   :  { %v306_v61 = vpop.eup %305 }
 0x2d1   :  { %v225_v62 = vmul.f32 %v306_v61, %v209_v47 }
 0x2d3   :  { %v231_v63 = vmul.f32 %v230_v25, %v225_v62 }
 0x2d4   :  { %v308_v0 = vpop.eup %307 }
 0x2d5   :  { %v226_v1 = vmul.f32 %v308_v0, %v210_v51  ;;  %v237_v2 = vadd.f32 %v236_v26, %v231_v63 }
 0x2d7   :  { %v232_v3 = vmul.f32 %v230_v25, %v226_v1  ;;  %239 = vst.msk [vmem:[#allocation3] sm:$0xff] %vm26_vm1, %v237_v2 }
 0x2d9   :  { %v238_v4 = vadd.f32 %v236_v26, %v232_v3 }
 0x2db   :  { %240 = vst.msk [vmem:[#allocation3 + $0x8] sm:$0xff] %vm26_vm1, %v238_v4 }
 0x2dc   :  { %320 = shalt.err (!%p317_p4)
}
 0x2dd   :  { %s334_s11 = smov 128   ;;  %s335_s12 = smov 8  }
 0x2de   :  { %252 = dma.vmem_to_hbm [thread:$0]  %s247_s4, 256, %s415_s5, [#allocation4], %s334_s11, %s334_s11, %s335_s12  }
 0x2df   :  { %329 = dma.done.wait [#allocation4], 256  }
 0x2e0   :  { %330 = vsyncadd [#allocation4], 4294967040 }
 0x2e1   :  { %256 = vsyncpa [#allocation4], 1 }

</bundles_post_ra>
